<compile_context>
chip_gen: v7x
topology: tpu7x:2x2x1
jax: 0.10.0
libtpu: 0.0.40
codegen_flags: <defaults>
</compile_context>

<pallas_src>
import jax
import jax.numpy as jnp
from jax.experimental import pallas as pl
from jax.experimental.pallas import tpu as pltpu

LEAKY_SLOPE = 0.2
IN_EPS = 1e-5

H1, H2 = 100, 150          # logical hidden widths (fixed by the module)
H1_PAD, H2_PAD = 128, 256  # lane-aligned padded widths


def _round_up(n, m):
    return ((n + m - 1) // m) * m


def _norm_act(h, logical_n):
    """InstanceNorm1d (no affine, eps=1e-5) over features + LeakyReLU(0.2).

    `h` may carry zero-padded trailing feature columns; they are exactly zero
    so the sums are unaffected, and the divisor is the logical feature count.
    """
    inv_n = jnp.float32(1.0 / logical_n)
    s1 = jnp.sum(h, axis=-1, keepdims=True)
    s2 = jnp.sum(h * h, axis=-1, keepdims=True)       # independent of s1
    mu = s1 * inv_n
    var = jnp.maximum(s2 * inv_n - mu * mu, 0.0)       # one-pass variance
    hn = (h - mu) * jax.lax.rsqrt(var + IN_EPS)
    return jnp.where(hn >= 0.0, hn, LEAKY_SLOPE * hn)


def _critic_kernel(x_ref, w1_ref, b1_ref, w2_ref, b2_ref, w3t_ref, b3t_ref, o_ref):
    """One batch tile: 2 MXU matmuls + 2 norm/act blocks + lane-dense head."""
    x = x_ref[...]

    h1 = jnp.dot(x, w1_ref[...], preferred_element_type=jnp.float32) + b1_ref[...]
    h1 = _norm_act(h1, H1)

    h2 = jnp.dot(h1, w2_ref[...], preferred_element_type=jnp.float32) + b2_ref[...]
    h2 = _norm_act(h2, H2)

    # Final layer, lane-dense: (O, K) contracted with (TB, K) over K -> (O, TB).
    # Batch ends up on the lane axis so the output store is unmasked for
    # TB that is a multiple of 128.
    out = jax.lax.dot_general(
        w3t_ref[...], h2,
        dimension_numbers=(((1,), (1,)), ((), ())),
        preferred_element_type=jnp.float32,
    )
    o_ref[...] = out + b3t_ref[...]


def prepare_params(params):
    """Zero-pad PyTorch-shaped params once to lane-aligned kernel shapes.

    Input:  w1 (F,100), b1 (1,100), w2 (100,150), b2 (1,150), w3 (150,O), b3 (1,O)
    Output: w1p (F,128), b1p (1,128), w2p (128,256), b2p (1,256),
            w3t (O,256),  b3t (O,1)
    """
    w1, b1, w2, b2, w3, b3 = params
    f32 = jnp.float32
    F = w1.shape[0]
    O = w3.shape[1]
    w1p = jnp.zeros((F, H1_PAD), f32).at[:, :H1].set(w1.astype(f32))
    b1p = jnp.zeros((1, H1_PAD), f32).at[:, :H1].set(b1.astype(f32))
    w2p = jnp.zeros((H1_PAD, H2_PAD), f32).at[:H1, :H2].set(w2.astype(f32))
    b2p = jnp.zeros((1, H2_PAD), f32).at[:, :H2].set(b2.astype(f32))
    w3t = jnp.zeros((O, H2_PAD), f32).at[:, :H2].set(w3.astype(f32).T)
    b3t = jnp.asarray(b3, f32).reshape(O, 1)
    return (w1p, b1p, w2p, b2p, w3t, b3t)


def critic_forward(x, padded_params, *, batch_tile=256):
    """x: (B, F) float32; padded_params from prepare_params(). Returns (B, out_dim)."""
    w1p, b1p, w2p, b2p, w3t, b3t = padded_params
    B, F = x.shape
    assert w1p.shape[0] == F, (w1p.shape, F)
    out_dim = w3t.shape[0]

    # Batch tiling: small batches -> single grid step (tile = padded batch);
    # large batches -> 256-row tiles (multiple of 128 keeps the lane-dense
    # output block unmasked) with parallel semantics for megacore / v7x.
    if B <= batch_tile:
        tb = _round_up(B, 8)
    else:
        tb = batch_tile
    b_pad = _round_up(B, tb)
    if b_pad != B:
        x = jnp.pad(x, ((0, b_pad - B), (0, 0)))

    grid = (b_pad // tb,)

    def const_spec(arr):
        # Weights/biases: full array resident, same block for every grid step.
        return pl.BlockSpec(arr.shape, lambda i: (0, 0))

    out_t = pl.pallas_call(
        _critic_kernel,
        out_shape=jax.ShapeDtypeStruct((out_dim, b_pad), jnp.float32),
        grid=grid,
        in_specs=[
            pl.BlockSpec((tb, F), lambda i: (i, 0)),   # x: batch-tiled
            const_spec(w1p), const_spec(b1p),
            const_spec(w2p), const_spec(b2p),
            const_spec(w3t), const_spec(b3t),
        ],
        out_specs=pl.BlockSpec((out_dim, tb), lambda i: (0, i)),  # lane-dense
        compiler_params=pltpu.CompilerParams(
            dimension_semantics=("parallel",),
        ),
    )(x, w1p, b1p, w2p, b2p, w3t, b3t)

    # (out_dim, B_pad) -> (B, out_dim); for out_dim == 1 this is a free reshape.
    return out_t.T[:B]


def init_params(key, feature_dim, output_dim=1):
    """PyTorch Linear default init: U(-1/sqrt(in), 1/sqrt(in)); weights stored (in, out)."""
    dims = [(feature_dim, H1), (H1, H2), (H2, output_dim)]
    params = []
    for din, dout in dims:
        key, kw, kb = jax.random.split(key, 3)
        bound = 1.0 / float(jnp.sqrt(jnp.float32(din)))
        w = jax.random.uniform(kw, (din, dout), jnp.float32, -bound, bound)
        b = jax.random.uniform(kb, (1, dout), jnp.float32, -bound, bound)
        params += [w, b]
    return tuple(params)


def critic_reference(x, params):
    """Pure-JAX reference (unpadded, two-pass variance) for correctness checking."""
    w1, b1, w2, b2, w3, b3 = params

    def norm_act(h):
        mu = jnp.mean(h, axis=-1, keepdims=True)
        var = jnp.mean(jnp.square(h - mu), axis=-1, keepdims=True)
        hn = (h - mu) / jnp.sqrt(var + IN_EPS)
        return jnp.where(hn >= 0.0, hn, LEAKY_SLOPE * hn)

    h1 = norm_act(x @ w1 + b1)
    h2 = norm_act(h1 @ w2 + b2)
    return h2 @ w3 + b3


if __name__ == "__main__":
    B, F = 8, 16  # small batch, feature_dimension=16
    key = jax.random.PRNGKey(0)
    key, kx = jax.random.split(key)
    x = jax.random.normal(kx, (B, F), jnp.float32)

    params = init_params(key, F, output_dim=1)
    padded = prepare_params(params)

    out = critic_forward(x, padded)
    out = jax.block_until_ready(out)

    ref = critic_reference(x, params)
    assert out.shape == (B, 1), out.shape
    max_err = float(jnp.max(jnp.abs(out - ref)))
    assert jnp.allclose(out, ref, atol=1e-4, rtol=1e-4), (
        f"mismatch vs reference: max abs err {max_err}"
    )
    print("KERNEL_OK")
</pallas_src>

<mosaic_0001>
module attributes {stable_mosaic.version = 11 : i64} {
  func.func @_critic_kernel(%arg0: i32, %arg1: memref<8x16xf32, #tpu.memory_space<vmem>>, %arg2: memref<16x128xf32, #tpu.memory_space<vmem>>, %arg3: memref<1x128xf32, #tpu.memory_space<vmem>>, %arg4: memref<128x256xf32, #tpu.memory_space<vmem>>, %arg5: memref<1x256xf32, #tpu.memory_space<vmem>>, %arg6: memref<1x256xf32, #tpu.memory_space<vmem>>, %arg7: memref<1x1xf32, #tpu.memory_space<vmem>>, %arg8: memref<1x8xf32, #tpu.memory_space<vmem>>) attributes {dimension_semantics = [#tpu.dimension_semantics<parallel>], iteration_bounds = array<i64: 1>, scalar_prefetch = 0 : i64, scratch_operands = 0 : i64, tpu.core_type = #tpu.core_type<tc>, window_params = [{transform_indices = @transform_0, window_bounds = array<i64: 8, 16>}, {pipeline_mode = #tpu.pipeline_mode<synchronous>, transform_indices = @transform_1, window_bounds = array<i64: 16, 128>}, {pipeline_mode = #tpu.pipeline_mode<synchronous>, transform_indices = @transform_2, window_bounds = array<i64: 1, 128>}, {pipeline_mode = #tpu.pipeline_mode<synchronous>, transform_indices = @transform_3, window_bounds = array<i64: 128, 256>}, {pipeline_mode = #tpu.pipeline_mode<synchronous>, transform_indices = @transform_4, window_bounds = array<i64: 1, 256>}, {pipeline_mode = #tpu.pipeline_mode<synchronous>, transform_indices = @transform_5, window_bounds = array<i64: 1, 256>}, {pipeline_mode = #tpu.pipeline_mode<synchronous>, transform_indices = @transform_6, window_bounds = array<i64: 1, 1>}, {transform_indices = @transform_7, window_bounds = array<i64: 1, 8>}]} {
    %c0 = arith.constant 0 : index
    %c0_0 = arith.constant 0 : index
    %0 = vector.load %arg1[%c0, %c0_0] : memref<8x16xf32, #tpu.memory_space<vmem>>, vector<8x16xf32>
    %c0_1 = arith.constant 0 : index
    %c0_2 = arith.constant 0 : index
    %1 = vector.load %arg2[%c0_1, %c0_2] : memref<16x128xf32, #tpu.memory_space<vmem>>, vector<16x128xf32>
    %cst = arith.constant dense<0.000000e+00> : vector<8x128xf32>
    %2 = tpu.matmul %0, %1, %cst {dimension_numbers = #tpu.dot_dimension_numbers<[1], [0], [0], [1], [0, 0, 1, 1], [], []>} : vector<8x16xf32>, vector<16x128xf32>, vector<8x128xf32> -> vector<8x128xf32>
    %c0_3 = arith.constant 0 : index
    %c0_4 = arith.constant 0 : index
    %3 = vector.load %arg3[%c0_3, %c0_4] : memref<1x128xf32, #tpu.memory_space<vmem>>, vector<1x128xf32>
    %4 = vector.broadcast %3 : vector<1x128xf32> to vector<8x128xf32>
    %5 = arith.addf %2, %4 : vector<8x128xf32>
    %cst_5 = arith.constant dense<0.000000e+00> : vector<8xf32>
    %6 = vector.multi_reduction <add>, %5, %cst_5 [1] : vector<8x128xf32> to vector<8xf32>
    %7 = vector.shape_cast %6 : vector<8xf32> to vector<8x1xf32>
    %8 = arith.mulf %5, %5 : vector<8x128xf32>
    %cst_6 = arith.constant dense<0.000000e+00> : vector<8xf32>
    %9 = vector.multi_reduction <add>, %8, %cst_6 [1] : vector<8x128xf32> to vector<8xf32>
    %10 = vector.shape_cast %9 : vector<8xf32> to vector<8x1xf32>
    %cst_7 = arith.constant 0.00999999977 : f32
    %11 = vector.broadcast %cst_7 : f32 to vector<8x1xf32>
    %12 = arith.mulf %7, %11 : vector<8x1xf32>
    %cst_8 = arith.constant 0.00999999977 : f32
    %13 = vector.broadcast %cst_8 : f32 to vector<8x1xf32>
    %14 = arith.mulf %10, %13 : vector<8x1xf32>
    %15 = arith.mulf %12, %12 : vector<8x1xf32>
    %16 = arith.subf %14, %15 : vector<8x1xf32>
    %cst_9 = arith.constant 0.000000e+00 : f32
    %17 = vector.broadcast %cst_9 : f32 to vector<8x1xf32>
    %18 = arith.maximumf %16, %17 : vector<8x1xf32>
    %19 = vector.broadcast %12 : vector<8x1xf32> to vector<8x128xf32>
    %20 = arith.subf %5, %19 : vector<8x128xf32>
    %cst_10 = arith.constant 9.99999974E-6 : f32
    %21 = vector.broadcast %cst_10 : f32 to vector<8x1xf32>
    %22 = arith.addf %18, %21 : vector<8x1xf32>
    %23 = math.rsqrt %22 : vector<8x1xf32>
    %24 = vector.broadcast %23 : vector<8x1xf32> to vector<8x128xf32>
    %25 = arith.mulf %20, %24 : vector<8x128xf32>
    %cst_11 = arith.constant 0.000000e+00 : f32
    %26 = vector.broadcast %cst_11 : f32 to vector<8x128xf32>
    %27 = arith.cmpf oge, %25, %26 : vector<8x128xf32>
    %cst_12 = arith.constant 2.000000e-01 : f32
    %28 = vector.broadcast %cst_12 : f32 to vector<8x128xf32>
    %29 = arith.mulf %28, %25 : vector<8x128xf32>
    %30 = arith.select %27, %25, %29 : vector<8x128xi1>, vector<8x128xf32>
    %c0_13 = arith.constant 0 : index
    %c0_14 = arith.constant 0 : index
    %31 = vector.load %arg4[%c0_13, %c0_14] : memref<128x256xf32, #tpu.memory_space<vmem>>, vector<128x256xf32>
    %cst_15 = arith.constant dense<0.000000e+00> : vector<8x256xf32>
    %32 = tpu.matmul %30, %31, %cst_15 {dimension_numbers = #tpu.dot_dimension_numbers<[1], [0], [0], [1], [0, 0, 1, 1], [], []>} : vector<8x128xf32>, vector<128x256xf32>, vector<8x256xf32> -> vector<8x256xf32>
    %c0_16 = arith.constant 0 : index
    %c0_17 = arith.constant 0 : index
    %33 = vector.load %arg5[%c0_16, %c0_17] : memref<1x256xf32, #tpu.memory_space<vmem>>, vector<1x256xf32>
    %34 = vector.broadcast %33 : vector<1x256xf32> to vector<8x256xf32>
    %35 = arith.addf %32, %34 : vector<8x256xf32>
    %cst_18 = arith.constant dense<0.000000e+00> : vector<8xf32>
    %36 = vector.multi_reduction <add>, %35, %cst_18 [1] : vector<8x256xf32> to vector<8xf32>
    %37 = vector.shape_cast %36 : vector<8xf32> to vector<8x1xf32>
    %38 = arith.mulf %35, %35 : vector<8x256xf32>
    %cst_19 = arith.constant dense<0.000000e+00> : vector<8xf32>
    %39 = vector.multi_reduction <add>, %38, %cst_19 [1] : vector<8x256xf32> to vector<8xf32>
    %40 = vector.shape_cast %39 : vector<8xf32> to vector<8x1xf32>
    %cst_20 = arith.constant 0.00666666683 : f32
    %41 = vector.broadcast %cst_20 : f32 to vector<8x1xf32>
    %42 = arith.mulf %37, %41 : vector<8x1xf32>
    %cst_21 = arith.constant 0.00666666683 : f32
    %43 = vector.broadcast %cst_21 : f32 to vector<8x1xf32>
    %44 = arith.mulf %40, %43 : vector<8x1xf32>
    %45 = arith.mulf %42, %42 : vector<8x1xf32>
    %46 = arith.subf %44, %45 : vector<8x1xf32>
    %cst_22 = arith.constant 0.000000e+00 : f32
    %47 = vector.broadcast %cst_22 : f32 to vector<8x1xf32>
    %48 = arith.maximumf %46, %47 : vector<8x1xf32>
    %49 = vector.broadcast %42 : vector<8x1xf32> to vector<8x256xf32>
    %50 = arith.subf %35, %49 : vector<8x256xf32>
    %cst_23 = arith.constant 9.99999974E-6 : f32
    %51 = vector.broadcast %cst_23 : f32 to vector<8x1xf32>
    %52 = arith.addf %48, %51 : vector<8x1xf32>
    %53 = math.rsqrt %52 : vector<8x1xf32>
    %54 = vector.broadcast %53 : vector<8x1xf32> to vector<8x256xf32>
    %55 = arith.mulf %50, %54 : vector<8x256xf32>
    %cst_24 = arith.constant 0.000000e+00 : f32
    %56 = vector.broadcast %cst_24 : f32 to vector<8x256xf32>
    %57 = arith.cmpf oge, %55, %56 : vector<8x256xf32>
    %cst_25 = arith.constant 2.000000e-01 : f32
    %58 = vector.broadcast %cst_25 : f32 to vector<8x256xf32>
    %59 = arith.mulf %58, %55 : vector<8x256xf32>
    %60 = arith.select %57, %55, %59 : vector<8x256xi1>, vector<8x256xf32>
    %c0_26 = arith.constant 0 : index
    %c0_27 = arith.constant 0 : index
    %61 = vector.load %arg6[%c0_26, %c0_27] : memref<1x256xf32, #tpu.memory_space<vmem>>, vector<1x256xf32>
    %cst_28 = arith.constant dense<0.000000e+00> : vector<1x8xf32>
    %62 = tpu.matmul %61, %60, %cst_28 {dimension_numbers = #tpu.dot_dimension_numbers<[1], [1], [0], [0], [0, 0, 1, 0], [], []>} : vector<1x256xf32>, vector<8x256xf32>, vector<1x8xf32> -> vector<1x8xf32>
    %c0_29 = arith.constant 0 : index
    %c0_30 = arith.constant 0 : index
    %63 = vector.load %arg7[%c0_29, %c0_30] : memref<1x1xf32, #tpu.memory_space<vmem>>, vector<1x1xf32>
    %64 = vector.broadcast %63 : vector<1x1xf32> to vector<1x8xf32>
    %65 = arith.addf %62, %64 : vector<1x8xf32>
    %c0_31 = arith.constant 0 : index
    %c0_32 = arith.constant 0 : index
    %66 = vector.load %arg8[%c0_31, %c0_32] : memref<1x8xf32, #tpu.memory_space<vmem>>, vector<1x8xf32>
    tpu.vector_store %arg8[%c0_31, %c0_32], %65 {strides = array<i32>} : memref<1x8xf32, #tpu.memory_space<vmem>>, vector<1x8xf32>,
    return
  }
  func.func @transform_0(%arg0: i32) -> (i32, i32) {
    %c0_i32 = arith.constant 0 : i32
    %c0_i32_0 = arith.constant 0 : i32
    return %arg0, %c0_i32 : i32, i32
  }
  func.func @transform_1(%arg0: i32) -> (i32, i32) {
    %c0_i32 = arith.constant 0 : i32
    %c0_i32_0 = arith.constant 0 : i32
    %c0_i32_1 = arith.constant 0 : i32
    return %c0_i32, %c0_i32_0 : i32, i32
  }
  func.func @transform_2(%arg0: i32) -> (i32, i32) {
    %c0_i32 = arith.constant 0 : i32
    %c0_i32_0 = arith.constant 0 : i32
    %c0_i32_1 = arith.constant 0 : i32
    return %c0_i32, %c0_i32_0 : i32, i32
  }
  func.func @transform_3(%arg0: i32) -> (i32, i32) {
    %c0_i32 = arith.constant 0 : i32
    %c0_i32_0 = arith.constant 0 : i32
    %c0_i32_1 = arith.constant 0 : i32
    return %c0_i32, %c0_i32_0 : i32, i32
  }
  func.func @transform_4(%arg0: i32) -> (i32, i32) {
    %c0_i32 = arith.constant 0 : i32
    %c0_i32_0 = arith.constant 0 : i32
    %c0_i32_1 = arith.constant 0 : i32
    return %c0_i32, %c0_i32_0 : i32, i32
  }
  func.func @transform_5(%arg0: i32) -> (i32, i32) {
    %c0_i32 = arith.constant 0 : i32
    %c0_i32_0 = arith.constant 0 : i32
    %c0_i32_1 = arith.constant 0 : i32
    return %c0_i32, %c0_i32_0 : i32, i32
  }
  func.func @transform_6(%arg0: i32) -> (i32, i32) {
    %c0_i32 = arith.constant 0 : i32
    %c0_i32_0 = arith.constant 0 : i32
    %c0_i32_1 = arith.constant 0 : i32
    return %c0_i32, %c0_i32_0 : i32, i32
  }
  func.func @transform_7(%arg0: i32) -> (i32, i32) {
    %c0_i32 = arith.constant 0 : i32
    %c0_i32_0 = arith.constant 0 : i32
    return %c0_i32, %arg0 : i32, i32
  }
}

</mosaic_0001>

<bundles_post_ra>
// kernel: tpu_custom_call.1
= control target key start
LH: loop header
LB: loop body
LE: loop exit
PB: predicated region body
PF: predicated region fallthrough
CT: control target
= control target key end

     0   :  { %s695_s0 = inlined_call_operand.hbm [shape: f32[8,16], index: 0, kind: input, shape index: {}]   ;;  %s696_s1 = inlined_call_operand.hbm [shape: f32[16,128], index: 1, kind: input, shape index: {}]   ;;  %s697_s2 = inlined_call_operand.vmem [shape: f32[1,128], index: 2, kind: input, shape index: {}]   ;;  %s698_s3 = inlined_call_operand.hbm [shape: f32[128,256], index: 3, kind: input, shape index: {}]   ;;  %s699_s4 = inlined_call_operand.vmem [shape: f32[1,256], index: 4, kind: input, shape index: {}]   ;;  %s700_s5 = inlined_call_operand.vmem [shape: f32[1,256], index: 5, kind: input, shape index: {}]   ;;  %s701_s6 = inlined_call_operand.<no memory space> [shape: f32[1,1], index: 6, kind: input, shape index: {}]   ;;  %s702_s7 = inlined_call_operand.hbm [shape: f32[1,8], index: 7, kind: output, shape index: {}]  }
   0x1   :  { %v12_v0 = vstv %s701_s6 }
   0x2   :  { %13 = vst [vmem:[#allocation2] sm:$0x1] %v12_v0 }
   0x3   :  { %14 = vsyncpa [#allocation4], 0 }
   0x4   :  { %15 = vsyncpa [#allocation7], 0 }
   0x5   :  { %16 = vsyncpa [#allocation5], 0  ;;  %s577_s26 = smov [#allocation6]   ;;  %s483_s30 = scalar_lea.hbm %s696_s1, 256 }
   0x6   :  { %s32_s27 = sshll.u32 %s577_s26, 4  ;;  %p484_p0 = scmp.ne.s32.totalorder %s696_s1, %s483_s30  ;;  %s33_s27 = int_to_ptr.vmem [resolvable:$true] %s32_s27 }
   0x7   :  { %p487_p1 = scmp.lt.u32.totalorder %s483_s30, %s696_s1 }
   0x9   :  { %p489_p2 = pnand %p487_p1, %p484_p0 }
   0xb   :  { %492 = shalt.err (!%p489_p2)
}
   0xc   :  { %s493_s6 = scalar_lea.vmem %s33_s27, 256  ;;  %p498_p4 = scmp.lt.s32.totalorder %s33_s27, %s33_s27 }
   0xd   :  { %p494_p3 = scmp.ne.s32.totalorder %s33_s27, %s493_s6  ;;  %p499_p5 = scmp.lt.s32.totalorder %s493_s6, %s493_s6 }
   0xf   :  { %p500_p6 = por %p499_p5, %p498_p4 }
  0x11   :  { %p501_p7 = pnand %p500_p6, %p494_p3 }
  0x13   :  { %504 = shalt.err (!%p501_p7)
}
  0x14   :  { %s578_s12 = smov 128   ;;  %s579_s13 = smov 8  }
  0x15   :  { %38 = dma.hbm_to_vmem [thread:$0]  %s696_s1, 256, %s33_s27, [#allocation7], %s578_s12, %s578_s12, %s579_s13  }
  0x16   :  { %s580_s16 = smov [#allocation3]   ;;  %s581_s18 = smov [#allocation8]  }
  0x17   :  { %s23_s17 = sshll.u32 %s580_s16, 4  ;;  %s46_s19 = sshll.u32 %s581_s18, 4  ;;  %s24_s17 = int_to_ptr.vmem [resolvable:$true] %s23_s17  ;;  %s47_s19 = int_to_ptr.vmem [resolvable:$true] %s46_s19 }
  0x18   :  { %s505_s22 = scalar_lea.hbm %s695_s0, 128 }
  0x19   :  { %p506_p8 = scmp.ne.s32.totalorder %s695_s0, %s505_s22  ;;  %p509_p9 = scmp.lt.u32.totalorder %s505_s22, %s695_s0 }
  0x1b   :  { %p511_p10 = pnand %p509_p9, %p506_p8 }
  0x1d   :  { %514 = shalt.err (!%p511_p10)
}
  0x1e   :  { %s515_s1 = scalar_lea.vmem %s24_s17, 128  ;;  %p520_p12 = scmp.lt.s32.totalorder %s24_s17, %s24_s17 }
  0x1f   :  { %p516_p11 = scmp.ne.s32.totalorder %s24_s17, %s515_s1  ;;  %p521_p13 = scmp.lt.s32.totalorder %s515_s1, %s515_s1 }
  0x21   :  { %p522_p0 = por %p521_p13, %p520_p12 }
  0x23   :  { %p523_p1 = pnand %p522_p0, %p516_p11 }
  0x25   :  { %526 = shalt.err (!%p523_p1)
}
  0x26   :  { %26 = dma.hbm_to_vmem [thread:$0]  %s695_s0, 128, %s24_s17, [#allocation4]  }
  0x27   :  { %s527_s8 = scalar_lea.hbm %s698_s3, 4096 }
  0x28   :  { %p528_p2 = scmp.ne.s32.totalorder %s698_s3, %s527_s8  ;;  %p531_p3 = scmp.lt.u32.totalorder %s527_s8, %s698_s3 }
  0x2a   :  { %p533_p4 = pnand %p531_p3, %p528_p2 }
  0x2c   :  { %536 = shalt.err (!%p533_p4)
}
  0x2d   :  { %s537_s12 = scalar_lea.vmem %s47_s19, 4096  ;;  %p542_p6 = scmp.lt.s32.totalorder %s47_s19, %s47_s19 }
  0x2e   :  { %p538_p5 = scmp.ne.s32.totalorder %s47_s19, %s537_s12  ;;  %p543_p7 = scmp.lt.s32.totalorder %s537_s12, %s537_s12 }
  0x30   :  { %p544_p8 = por %p543_p7, %p542_p6 }
  0x32   :  { %p545_p9 = pnand %p544_p8, %p538_p5 }
  0x34   :  { %548 = shalt.err (!%p545_p9)
}
  0x35   :  { %s582_s0 = smov 256   ;;  %s583_s13 = smov 16  }
  0x36   :  { %52 = dma.hbm_to_vmem [thread:$0]  %s698_s3, 4096, %s47_s19, [#allocation7], %s582_s0, %s582_s0, %s583_s13  }
  0x37   :  { %571 = dma.done.wait [#allocation4], 128  }
  0x38   :  { %572 = vsyncadd [#allocation4], 4294967168 }
  0x39   :  { %573 = dma.done.wait [#allocation7], 4352  }
  0x3a   :  { %574 = vsyncadd [#allocation7], 4294962944  ;;  %v584_v1 = vmov 0.0|0.0   ;;  %vm585_vm0 = vmmov 0   ;;  %v586_v2 = vmov 0.0   ;;  %v69_v3 = vld [vmem:[#allocation6] sm:$0xff] }
  0x3b   :  { %431 = vmatprep.subr.bf16.mxu0 %v584_v1  ;;  %428 = vmatprep.mubr.msk.f32.mxu0 %vm585_vm0, %v586_v2  ;;  %v70_v4 = vld [vmem:[#allocation6 + $0x8] sm:$0xff]  ;;  %v68_v6 = vld [vmem:[#allocation3] sm:$0xff]  ;;  %vm78_vm1 = vcmask 130048   ;;  %v169_v9 = vld [vmem:[#allocation8] sm:$0xff]  ;;  %vm401_vm5 = vcmask 57344  }
  0x3c   :  { %277 = vmatprep.mubr.f32.mxu1 %v586_v2  ;;  %v432_v5 = vpack.c.bf16 %v70_v4, %v69_v3  ;;  %v170_v7 = vld [vmem:[#allocation8 + $0x8] sm:$0xff]  ;;  %v172_v8 = vld [vmem:[#allocation8 + $0x18] sm:$0xff]  ;;  %v171_v11 = vld [vmem:[#allocation8 + $0x10] sm:$0xff] }
  0x3d   :  { %v434_v10 = vpack.c.bf16 %v172_v8, %v170_v7  ;;  %v436_v12 = vpack.c.bf16 %v171_v11, %v169_v9  ;;  %v419_v13 = vld [vmem:[%s697_s2] ss:$0 sm:$0xff]  ;;  %v174_v18 = vld [vmem:[#allocation8 + $0x28] sm:$0xff]  ;;  %v176_v19 = vld [vmem:[#allocation8 + $0x38] sm:$0xff]  ;;  %v203_v9 = vlaneseq }
  0x3e   :  { %433 = vmatpush3.bf16.msra.mxu0 %v432_v5  ;;  %v438_v20 = vpack.c.bf16 %v176_v19, %v174_v18  ;;  %v173_v21 = vld [vmem:[#allocation8 + $0x20] sm:$0xff]  ;;  %v175_v22 = vld [vmem:[#allocation8 + $0x30] sm:$0xff]  ;;  %v178_v24 = vld [vmem:[#allocation8 + $0x48] sm:$0xff] }
  0x3f   :  { %435 = vmatprep.subr.bf16.mxu1 %v434_v10  ;;  %v440_v23 = vpack.c.bf16 %v175_v22, %v173_v21  ;;  %v180_v25 = vld [vmem:[#allocation8 + $0x58] sm:$0xff]  ;;  %v177_v27 = vld [vmem:[#allocation8 + $0x40] sm:$0xff]  ;;  %v179_v28 = vld [vmem:[#allocation8 + $0x50] sm:$0xff]  ;;  %v204_v10 = vshrl.u32 %v203_v9, 7 }
  0x40   :  { %437 = vmatpush1.bf16.msra.mxu1 %v436_v12  ;;  %v442_v26 = vpack.c.bf16 %v180_v25, %v178_v24  ;;  %v444_v29 = vpack.c.bf16 %v179_v28, %v177_v27  ;;  %v182_v30 = vld [vmem:[#allocation8 + $0x68] sm:$0xff]  ;;  %v184_v31 = vld [vmem:[#allocation8 + $0x78] sm:$0xff]  ;;  %v181_v33 = vld [vmem:[#allocation8 + $0x60] sm:$0xff]  ;;  %v587_v27 = vmov 0  }
  0x41   :  { %429 = vmatmul.mubr.msk.f32.vlgmr.msra.gmra.mrb[0].mxu0 %vm78_vm1, %v68_v6  ;;  %439 = vmatprep.subr.bf16.mxu1 %v438_v20  ;;  %v446_v32 = vpack.c.bf16 %v184_v31, %v182_v30  ;;  %v183_v34 = vld [vmem:[#allocation8 + $0x70] sm:$0xff]  ;;  %v186_v36 = vld [vmem:[#allocation8 + $0x88] sm:$0xff]  ;;  %v188_v37 = vld [vmem:[#allocation8 + $0x98] sm:$0xff]  ;;  %v205_v11 = vsub.s32 0, %v204_v10 }
  0x42   :  { %v448_v35 = vpack.c.bf16 %v183_v34, %v181_v33  ;;  %v450_v38 = vpack.c.bf16 %v188_v37, %v186_v36  ;;  %v185_v39 = vld [vmem:[#allocation8 + $0x80] sm:$0xff]  ;;  %v187_v40 = vld [vmem:[#allocation8 + $0x90] sm:$0xff]  ;;  %v190_v42 = vld [vmem:[#allocation8 + $0xa8] sm:$0xff]  ;;  %478 = vset.pattern.permute.xlu0 %v587_v27 }
  0x43   :  { %v452_v41 = vpack.c.bf16 %v187_v40, %v185_v39  ;;  %v192_v43 = vld [vmem:[#allocation8 + $0xb8] sm:$0xff]  ;;  %v189_v44 = vld [vmem:[#allocation8 + $0xa0] sm:$0xff]  ;;  %v191_v46 = vld [vmem:[#allocation8 + $0xb0] sm:$0xff] }
  0x44   :  { %441 = vmatpush1.bf16.msra.mxu1 %v440_v23  ;;  %v454_v45 = vpack.c.bf16 %v192_v43, %v190_v42  ;;  %v194_v47 = vld [vmem:[#allocation8 + $0xc8] sm:$0xff]  ;;  %v196_v48 = vld [vmem:[#allocation8 + $0xd8] sm:$0xff]  ;;  %v456_v49 = vpack.c.bf16 %v191_v46, %v189_v44  ;;  %v193_v51 = vld [vmem:[#allocation8 + $0xc0] sm:$0xff] }
  0x45   :  { %443 = vmatprep.subr.bf16.mxu1 %v442_v26  ;;  %v458_v50 = vpack.c.bf16 %v196_v48, %v194_v47  ;;  %v195_v52 = vld [vmem:[#allocation8 + $0xd0] sm:$0xff]  ;;  %v198_v53 = vld [vmem:[#allocation8 + $0xe8] sm:$0xff]  ;;  %v200_v54 = vld [vmem:[#allocation8 + $0xf8] sm:$0xff] }
  0x46   :  { %v460_v55 = vpack.c.bf16 %v195_v52, %v193_v51  ;;  %v462_v56 = vpack.c.bf16 %v200_v54, %v198_v53  ;;  %v197_v57 = vld [vmem:[#allocation8 + $0xe0] sm:$0xff]  ;;  %v199_v58 = vld [vmem:[#allocation8 + $0xf0] sm:$0xff] }
  0x47   :  { %v464_v59 = vpack.c.bf16 %v199_v58, %v197_v57  ;;  %v201_v12 = vld [vmem:[%s699_s4] sm:$0x3]  ;;  %s588_s4 = smov [#allocation9]  }
  0x48   :  { %445 = vmatpush1.bf16.msra.mxu1 %v444_v29  ;;  %v309_v24 = vld [vmem:[%s700_s5] sm:$0x3]  ;;  %s409_s5 = sshll.u32 %s588_s4, 4  ;;  %s410_s5 = int_to_ptr.vmem [resolvable:$true] %s409_s5 }
  0x49   :  { %447 = vmatprep.subr.bf16.mxu1 %v446_v32  ;;  %v310_v26 = vld [vmem:[#allocation2] sm:$0x1]  ;;  %s549_s20 = scalar_lea.vmem %s410_s5, 16  ;;  %s553_s21 = scalar_lea.vmem %s410_s5, 32 }
  0x4a   :  { %p550_p10 = scmp.ne.s32.totalorder %s410_s5, %s549_s20  ;;  %p554_p11 = scmp.lt.s32.totalorder %s410_s5, %s410_s5 }
  0x4b   :  { %p555_p12 = scmp.lt.s32.totalorder %s553_s21, %s549_s20 }
  0x4c   :  { %449 = vmatpush1.bf16.msra.mxu1 %v448_v35 }
  0x4d   :  { %451 = vmatprep.subr.bf16.mxu1 %v450_v38  ;;  %p556_p13 = por %p555_p12, %p554_p11 }
  0x4f   :  { %p557_p0 = pnand %p556_p13, %p550_p10 }
  0x50   :  { %453 = vmatpush1.bf16.msra.mxu1 %v452_v41 }
  0x51   :  { %455 = vmatprep.subr.bf16.mxu1 %v454_v45  ;;  %v324_v45 = vrot.slane %v309_v24, %v205_v11 }
  0x54   :  { %457 = vmatpush1.bf16.msra.mxu1 %v456_v49 }
  0x55   :  { %459 = vmatprep.subr.bf16.mxu1 %v458_v50 }
  0x58   :  { %461 = vmatpush1.bf16.msra.mxu1 %v460_v55 }
  0x59   :  { %463 = vmatprep.subr.bf16.mxu1 %v462_v56 }
  0x5c   :  { %465 = vmatpush1.bf16.msra.mxu1 %v464_v59 }
 0x114   :  { %v148_v14 = vpop.f32.mrb[0].mxu0 }
 0x115   :  { %v671_v15 = vadd.f32 %v419_v13, %v148_v14  ;;  %v430_v16 = vpop.f32.mrb[1].mxu0  ;;  %v209_v13 = vsub.s32 1, %v204_v10  ;;  %v206_v14 = vrot.slane %v201_v12, %v205_v11 }
 0x117   :  { %152 = vadd.xlane.f32.xlu0 %v671_v15  ;;  %v154_v17 = vmul.f32 %v671_v15, %v671_v15  ;;  %v210_v16 = vrot.slane %v201_v12, %v209_v13  ;;  %v328_v25 = vrot.slane %v309_v24, %v209_v13 }
 0x119   :  { %395 = vmatprep.mubr.f32.mxu0 %v328_v25 }
 0x11b   :  { %155 = vadd.xlane.f32.xlu0 %v154_v17 }
 0x131   :  { %313 = vperm.xlu0 %478, %v310_v26  }
 0x1a4   :  { %v153_v60 = vpop.xlane.xlu0 %152 }
 0x1a5   :  { %v157_v61 = vmul.f32 0.01, %v153_v60 }
 0x1a7   :  { %v159_v63 = vmul.f32 %v157_v61, %v157_v61  ;;  %v162_v4 = vsub.f32 %v671_v15, %v157_v61 }
 0x1a8   :  { %v156_v62 = vpop.xlane.xlu0 %155 }
 0x1a9   :  { %v158_v0 = vmul.f32 0.01, %v156_v62 }
 0x1ab   :  { %v160_v1 = vsub.f32 %v158_v0, %v159_v63 }
 0x1ad   :  { %v161_v2 = vmax.f32 %v160_v1, 0.0 }
 0x1af   :  { %v163_v3 = vadd.f32 1e-05, %v161_v2 }
 0x1b0   :  { %v314_v46 = vpop.permute.xlu0 %313 }
 0x1b1   :  { %479 = vrsqrt.f32 %v163_v3  ;;  %v319_v47 = vrot.slane %v314_v46, %v205_v11 }
 0x1bb   :  { %v480_v5 = vpop.eup %479 }
 0x1bc   :  { %v165_v6 = vmul.f32 %v480_v5, %v162_v4 }
 0x1be   :  { %vm166_vm2 = vcmp.ge.f32.partialorder %v165_v6, 0.0  ;;  %v167_v7 = vmul.f32 0.2, %v165_v6 }
 0x1c0   :  { %v168_v8 = vsel %vm166_vm2, %v165_v6, %v167_v7 }
 0x1c1   :  { %278 = vmatmul.mubr.f32.vlgmr.msra.gmra.mrb[0].mxu1 %v168_v8 }
 0x294   :  { %v279_v17 = vpop.f32.mrb[0].mxu1 }
 0x295   :  { %v280_v18 = vadd.f32 %v279_v17, %v206_v14  ;;  %v281_v19 = vpop.f32.mrb[1].mxu1 }
 0x296   :  { %v282_v15 = vadd.f32 %v281_v19, %v210_v16 }
 0x297   :  { %v287_v21 = vmul.f32 %v280_v18, %v280_v18 }
 0x298   :  { %v284_v20 = vadd.f32 %v282_v15, %v280_v18  ;;  %v288_v22 = vmul.f32 %v282_v15, %v282_v15 }
 0x29a   :  { %285 = vadd.xlane.f32.xlu1 %v284_v20  ;;  %v289_v23 = vadd.f32 %v288_v22, %v287_v21 }
 0x29e   :  { %290 = vadd.xlane.f32.xlu1 %v289_v23 }
 0x327   :  { %v286_v28 = vpop.xlane.xlu1 %285 }
 0x328   :  { %v292_v29 = vmul.f32 0.006666667, %v286_v28 }
 0x32a   :  { %v294_v31 = vmul.f32 %v292_v29, %v292_v29  ;;  %v297_v36 = vsub.f32 %v280_v18, %v292_v29  ;;  %v298_v37 = vsub.f32 %v282_v15, %v292_v29 }
 0x32b   :  { %v291_v30 = vpop.xlane.xlu1 %290 }
 0x32c   :  { %v293_v32 = vmul.f32 0.006666667, %v291_v30 }
 0x32e   :  { %v295_v33 = vsub.f32 %v293_v32, %v294_v31 }
 0x330   :  { %v296_v34 = vmax.f32 %v295_v33, 0.0 }
 0x332   :  { %v299_v35 = vadd.f32 1e-05, %v296_v34 }
 0x334   :  { %481 = vrsqrt.f32 %v299_v35 }
 0x33e   :  { %v482_v38 = vpop.eup %481 }
 0x33f   :  { %v302_v39 = vmul.f32 %v482_v38, %v298_v37  ;;  %v301_v40 = vmul.f32 %v482_v38, %v297_v36 }
 0x341   :  { %vm304_vm3 = vcmp.ge.f32.partialorder %v302_v39, 0.0  ;;  %v306_v41 = vmul.f32 0.2, %v302_v39  ;;  %vm303_vm4 = vcmp.ge.f32.partialorder %v301_v40, 0.0  ;;  %v305_v42 = vmul.f32 0.2, %v301_v40 }
 0x343   :  { %v308_v43 = vsel %vm304_vm3, %v302_v39, %v306_v41  ;;  %v307_v44 = vsel %vm303_vm4, %v301_v40, %v305_v42 }
 0x344   :  { %331 = vmatprep.subr.mxu0 %v308_v43 }
 0x345   :  { %332 = vmatpush1.xpose.msra.mxu0 %v307_v44 }
 0x348   :  { %396 = vmatmul.mubr.f32.vlgmr.msra.gmra.mrb[2].mxu0 %v324_v45 }
 0x41b   :  { %v397_v48 = vpop.f32.mrb[2].mxu0 }
 0x41c   :  { %v398_v49 = vadd.f32 %v397_v48, %v319_v47  ;;  %v399_v50 = vpop.f32.mrb[3].mxu0 }
 0x41e   :  { %402 = vst.msk [vmem:[#allocation9] sm:$0x1] %vm401_vm5, %v398_v49 }
 0x41f   :  { %560 = shalt.err (!%p557_p0)
}
 0x420   :  { %s561_s24 = scalar_lea.hbm %s702_s7, 16 }
 0x421   :  { %p562_p1 = scmp.ne.s32.totalorder %s702_s7, %s561_s24  ;;  %p565_p2 = scmp.lt.u32.totalorder %s561_s24, %s702_s7 }
 0x423   :  { %p567_p3 = pnand %p565_p2, %p562_p1 }
 0x425   :  { %570 = shalt.err (!%p567_p3)
}
 0x426   :  { %412 = dma.vmem_to_hbm [thread:$0]  %s410_s5, 16, %s702_s7, [#allocation5]  }
 0x427   :  { %575 = dma.done.wait [#allocation5], 16  }
 0x428   :  { %576 = vsyncadd [#allocation5], 4294967280 }
 0x429   :  { %416 = vsyncpa [#allocation4], 1 }
 0x42a   :  { %417 = vsyncpa [#allocation7], 1 }
 0x42b   :  { %418 = vsyncpa [#allocation5], 1 }

</bundles_post_ra>
